<compile_context>
chip_gen: v7x
topology: tpu7x:2x2x1
jax: 0.10.0
libtpu: 0.0.40
codegen_flags: <defaults>
</compile_context>

<pallas_src>
import jax
import jax.numpy as jnp
from jax.experimental import pallas as pl
from jax.experimental.pallas import tpu as pltpu


def _round_up(n: int, m: int) -> int:
    return ((n + m - 1) // m) * m


def _vmem_limit_bytes() -> int:
    """Generation-aware VMEM scoped limit."""
    try:
        cap = pltpu.get_tpu_info().vmem_capacity_bytes
    except Exception:
        cap = 64 * 1024 * 1024
    if cap >= 100 * 1024 * 1024:      # v5e / v6e: 128 MiB physical
        return 100 * 1024 * 1024
    return 48 * 1024 * 1024           # v7x: 64 MiB physical per TC


# ----------------------------------------------------------------------------
# Kernel
# ----------------------------------------------------------------------------
def resnet_block_kernel(
    x_ref, cond_ref,          # bf16 activation tiles (TB, d_in_p) / (TB, c_p)
    w1_ref, b1_ref,           # fc1 (+BN1 folded), hid tile: (d_in_p, thid) / (1, thid)
    wg1_ref, bg1_ref,         # glu1 gate projection, hid tile
    w2_ref,                   # fc2 (+BN2 folded), hid tile: (thid, d_in_p)
    b2_ref,                   # fc2 bias (+BN2 shift), resident (1, d_in_p)
    wg2_ref, bg2_ref,         # glu2 gate projection, resident
    out_ref,                  # (TB, d_in_p) f32
    acc_ref,                  # VMEM scratch (TB, d_in_p) f32: fc2 accumulator over hid
):
    k = pl.program_id(1)

    @pl.when(k == 0)
    def _():
        acc_ref[...] = jnp.zeros_like(acc_ref)

    x = x_ref[...]            # bf16
    cond = cond_ref[...]      # bf16

    # fc1 tile (+BN1 folded) -> GELU(tanh) -> GLU1 gate (elementwise along hid tile).
    h = jnp.dot(x, w1_ref[...], preferred_element_type=jnp.float32) + b1_ref[...]
    h = jax.nn.gelu(h, approximate=True)
    g1 = jax.nn.sigmoid(
        jnp.dot(cond, wg1_ref[...], preferred_element_type=jnp.float32) + bg1_ref[...])
    h = h * g1
    # dropout p = 0.0 -> Identity

    # fc2 partial product for this hid tile, accumulated in f32.
    acc_ref[...] += jnp.dot(h.astype(jnp.bfloat16), w2_ref[...],
                            preferred_element_type=jnp.float32)

    @pl.when(k == pl.num_programs(1) - 1)
    def _():
        y = acc_ref[...] + b2_ref[...]                     # fc2 bias (+BN2 shift)
        y = jax.nn.gelu(y, approximate=True)
        g2 = jax.nn.sigmoid(
            jnp.dot(cond, wg2_ref[...], preferred_element_type=jnp.float32) + bg2_ref[...])
        y = y * g2
        # dropout p = 0.0 -> Identity; residual add.
        out_ref[...] = y + x.astype(jnp.float32)


# ----------------------------------------------------------------------------
# One-time weight preparation (hoisted out of the per-call hot path)
# ----------------------------------------------------------------------------
def prepare_params(params, *, vmem_limit_bytes=None):
    """Fold BatchNorm (eval), pad feature dims to 128 multiples, cast weights to bf16,
    and pick the hid-axis tiling.  Call ONCE; the result is reused by every forward."""
    d_in, hid = params["w1"].shape
    c_dim = params["wg1"].shape[0]
    d_in_p = _round_up(d_in, 128)
    c_p = _round_up(c_dim, 128)

    if vmem_limit_bytes is None:
        vmem_limit_bytes = _vmem_limit_bytes()
    weight_budget = vmem_limit_bytes // 2      # leave headroom for activation tiles

    # Pick the hid tile: largest (multiple of 128) whose per-step weight footprint fits.
    n_hid = 1
    while True:
        thid = _round_up(-(-hid // n_hid), 128)
        bufs = 1 if n_hid == 1 else 2          # streamed weight tiles double-buffer
        per_step = 2 * thid * (2 * d_in_p + c_p) + 2 * 4 * thid     # w1,w2,wg1 + b1,bg1
        resident = 2 * c_p * d_in_p + 2 * 4 * d_in_p                # wg2 + b2,bg2
        if bufs * per_step + resident <= weight_budget or thid <= 128:
            break
        n_hid *= 2
    hid_p = n_hid * thid

    # Fold BatchNorm (eval mode) into the linear layers.
    w1 = params["w1"] * params["bn1_scale"]
    b1 = params["b1"] * params["bn1_scale"] + params["bn1_shift"]
    w2 = params["w2"] * params["bn2_scale"]
    b2 = params["b2"] * params["bn2_scale"] + params["bn2_shift"]

    def pad2(a, rows, cols):
        return jnp.pad(a, ((0, rows - a.shape[0]), (0, cols - a.shape[1])))

    prepped = {
        "w1":  pad2(w1, d_in_p, hid_p).astype(jnp.bfloat16),
        "b1":  pad2(b1, 1, hid_p).astype(jnp.float32),
        "wg1": pad2(params["wg1"], c_p, hid_p).astype(jnp.bfloat16),
        "bg1": pad2(params["bg1"], 1, hid_p).astype(jnp.float32),
        "w2":  pad2(w2, hid_p, d_in_p).astype(jnp.bfloat16),
        "b2":  pad2(b2, 1, d_in_p).astype(jnp.float32),
        "wg2": pad2(params["wg2"], c_p, d_in_p).astype(jnp.bfloat16),
        "bg2": pad2(params["bg2"], 1, d_in_p).astype(jnp.float32),
    }
    meta = dict(d_in=d_in, hid=hid, c_dim=c_dim,
                d_in_p=d_in_p, hid_p=hid_p, c_p=c_p,
                n_hid_tiles=n_hid, thid=thid,
                vmem_limit_bytes=vmem_limit_bytes)
    return prepped, meta


# ----------------------------------------------------------------------------
# Forward wrapper
# ----------------------------------------------------------------------------
def resnet_block(x, condition, prepped, meta, *, batch_tile: int = 512):
    """Fused ResNetBlock forward: batch-tiled, hid-reduction Pallas kernel."""
    B = x.shape[0]
    d_in_p, hid_p, c_p = meta["d_in_p"], meta["hid_p"], meta["c_p"]
    n_hid, thid = meta["n_hid_tiles"], meta["thid"]

    # Batch tile: multiple of 8; if only one tile would result, halve it so v7x can
    # shard batch tiles across its two TensorCores (no-op on single-TC v5e/v6e).
    TB = min(_round_up(B, 8), _round_up(batch_tile, 8))
    while _round_up(B, TB) // TB < 2 and TB > 8:
        TB = _round_up(TB // 2, 8)
    B_p = _round_up(B, TB)
    n_bt = B_p // TB

    # Stream activations in bf16 (single cast, then pad the bf16 tensor).
    x_p = jnp.pad(x.astype(jnp.bfloat16),
                  ((0, B_p - B), (0, d_in_p - x.shape[1])))
    cond_p = jnp.pad(condition.astype(jnp.bfloat16),
                     ((0, B_p - B), (0, c_p - condition.shape[1])))

    resident = pl.Buffered(1)                               # constant index -> 1 buffer
    wbuf = pl.Buffered(1) if n_hid == 1 else pl.Buffered(2)  # hid-streamed weights

    in_specs = [
        # streamed / per-batch-tile activations (auto double-buffered)
        pl.BlockSpec((TB, d_in_p), lambda i, k: (i, 0)),                             # x
        pl.BlockSpec((TB, c_p), lambda i, k: (i, 0)),                                # cond
        # hid-tiled weights / biases
        pl.BlockSpec((d_in_p, thid), lambda i, k: (0, k), pipeline_mode=wbuf),       # w1
        pl.BlockSpec((1, thid), lambda i, k: (0, k), pipeline_mode=wbuf),            # b1
        pl.BlockSpec((c_p, thid), lambda i, k: (0, k), pipeline_mode=wbuf),          # wg1
        pl.BlockSpec((1, thid), lambda i, k: (0, k), pipeline_mode=wbuf),            # bg1
        pl.BlockSpec((thid, d_in_p), lambda i, k: (k, 0), pipeline_mode=wbuf),       # w2
        # fully resident (constant block index) -> single-buffered
        pl.BlockSpec((1, d_in_p), lambda i, k: (0, 0), pipeline_mode=resident),      # b2
        pl.BlockSpec((c_p, d_in_p), lambda i, k: (0, 0), pipeline_mode=resident),    # wg2
        pl.BlockSpec((1, d_in_p), lambda i, k: (0, 0), pipeline_mode=resident),      # bg2
    ]
    out_spec = pl.BlockSpec((TB, d_in_p), lambda i, k: (i, 0))

    # Advisory cost hint for XLA's scheduler.
    flops = 2 * B_p * (2 * d_in_p * hid_p + c_p * (hid_p + d_in_p))
    transcendentals = 2 * B_p * (hid_p + d_in_p)
    weight_bytes = sum(int(v.size) * v.dtype.itemsize for v in prepped.values())
    bytes_accessed = int(
        x_p.size * 2 + cond_p.size * 2 + B_p * d_in_p * 4
        + (n_bt if n_hid > 1 else 1) * weight_bytes
    )

    out_padded = pl.pallas_call(
        resnet_block_kernel,
        out_shape=jax.ShapeDtypeStruct((B_p, d_in_p), jnp.float32),
        grid=(n_bt, n_hid),
        in_specs=in_specs,
        out_specs=out_spec,
        scratch_shapes=[pltpu.VMEM((TB, d_in_p), jnp.float32)],
        compiler_params=pltpu.CompilerParams(
            dimension_semantics=("parallel", "arbitrary"),
            vmem_limit_bytes=meta["vmem_limit_bytes"],
        ),
        cost_estimate=pl.CostEstimate(
            flops=flops,
            transcendentals=transcendentals,
            bytes_accessed=bytes_accessed,
        ),
    )(x_p, cond_p,
      prepped["w1"], prepped["b1"], prepped["wg1"], prepped["bg1"],
      prepped["w2"], prepped["b2"], prepped["wg2"], prepped["bg2"])

    return out_padded[:B, :meta["d_in"]]


# ----------------------------------------------------------------------------
# Pure-JAX reference & synthetic parameters
# ----------------------------------------------------------------------------
def reference_forward(x, condition, params):
    """Pure-JAX f32 reference mirroring the torch forward pass (eval mode)."""
    h = x @ params["w1"] + params["b1"]
    h = h * params["bn1_scale"] + params["bn1_shift"]
    h = jax.nn.gelu(h, approximate=True)
    h = h * jax.nn.sigmoid(condition @ params["wg1"] + params["bg1"])
    y = h @ params["w2"] + params["b2"]
    y = y * params["bn2_scale"] + params["bn2_shift"]
    y = jax.nn.gelu(y, approximate=True)
    y = y * jax.nn.sigmoid(condition @ params["wg2"] + params["bg2"])
    return y + x


def init_params(key, input_dim, hidden_dim, condition_dim):
    """Deterministic synthetic parameters (shapes follow the torch __init__)."""
    ks = jax.random.split(key, 8)
    eps = 1e-5

    def lin(k, fan_in, fan_out):
        kw, kb = jax.random.split(k)
        bound = 1.0 / jnp.sqrt(fan_in)
        w = jax.random.uniform(kw, (fan_in, fan_out), jnp.float32, -bound, bound)
        b = jax.random.uniform(kb, (1, fan_out), jnp.float32, -bound, bound)
        return w, b

    w1, b1 = lin(ks[0], input_dim, hidden_dim)          # fc1
    wg1, bg1 = lin(ks[1], condition_dim, hidden_dim)    # glu1.fc
    w2, b2 = lin(ks[2], hidden_dim, input_dim)          # fc2
    wg2, bg2 = lin(ks[3], condition_dim, input_dim)     # glu2.fc

    # BatchNorm (eval mode): fold (gamma, beta, running_mean, running_var) into
    # an affine scale/shift per feature.
    def bn_fold(k, dim):
        kg, kb, km, kv = jax.random.split(k, 4)
        gamma = 1.0 + 0.1 * jax.random.normal(kg, (1, dim), jnp.float32)
        beta = 0.1 * jax.random.normal(kb, (1, dim), jnp.float32)
        mean = 0.05 * jax.random.normal(km, (1, dim), jnp.float32)
        var = 1.0 + 0.1 * jax.random.uniform(kv, (1, dim), jnp.float32)
        scale = gamma / jnp.sqrt(var + eps)
        shift = beta - mean * scale
        return scale, shift

    bn1_scale, bn1_shift = bn_fold(ks[4], hidden_dim)
    bn2_scale, bn2_shift = bn_fold(ks[5], input_dim)

    return {
        "w1": w1, "b1": b1, "bn1_scale": bn1_scale, "bn1_shift": bn1_shift,
        "wg1": wg1, "bg1": bg1,
        "w2": w2, "b2": b2, "bn2_scale": bn2_scale, "bn2_shift": bn2_shift,
        "wg2": wg2, "bg2": bg2,
    }


if __name__ == "__main__":
    key = jax.random.PRNGKey(0)
    k_params, k_x, k_c = jax.random.split(key, 3)

    B, input_dim, hidden_dim, condition_dim = 64, 32, 64, 16

    params = init_params(k_params, input_dim, hidden_dim, condition_dim)
    x = jax.random.normal(k_x, (B, input_dim), jnp.float32)
    condition = jax.random.normal(k_c, (B, condition_dim), jnp.float32)

    # One-time weight preparation (hoisted out of the per-call hot path).
    prepped, meta = prepare_params(params)

    out = resnet_block(x, condition, prepped, meta)
    out = jax.block_until_ready(out)

    ref = reference_forward(x, condition, params)
    assert out.shape == (B, input_dim)
    # Tolerance relaxed vs. the pure-f32 reference: activations and weights feed the
    # MXU as bf16 (f32 accumulation) — deliberate precision/throughput tradeoff.
    assert jnp.allclose(out, ref, atol=5e-2, rtol=5e-2), "mismatch vs reference"

    print("KERNEL_OK")
</pallas_src>

<mosaic_0001>
module attributes {stable_mosaic.version = 11 : i64} {
  func.func @resnet_block_kernel(%arg0: i32, %arg1: i32, %arg2: memref<32x128xbf16, #tpu.memory_space<vmem>>, %arg3: memref<32x128xbf16, #tpu.memory_space<vmem>>, %arg4: memref<128x128xbf16, #tpu.memory_space<vmem>>, %arg5: memref<1x128xf32, #tpu.memory_space<vmem>>, %arg6: memref<128x128xbf16, #tpu.memory_space<vmem>>, %arg7: memref<1x128xf32, #tpu.memory_space<vmem>>, %arg8: memref<128x128xbf16, #tpu.memory_space<vmem>>, %arg9: memref<1x128xf32, #tpu.memory_space<vmem>>, %arg10: memref<128x128xbf16, #tpu.memory_space<vmem>>, %arg11: memref<1x128xf32, #tpu.memory_space<vmem>>, %arg12: memref<32x128xf32, #tpu.memory_space<vmem>>, %arg13: memref<32x128xf32, #tpu.memory_space<vmem>>) attributes {dimension_semantics = [#tpu.dimension_semantics<parallel>, #tpu.dimension_semantics<arbitrary>], iteration_bounds = array<i64: 2, 1>, scalar_prefetch = 0 : i64, scratch_operands = 1 : i64, tpu.core_type = #tpu.core_type<tc>, window_params = [{transform_indices = @transform_0, window_bounds = array<i64: 32, 128>}, {transform_indices = @transform_1, window_bounds = array<i64: 32, 128>}, {pipeline_mode = #tpu.pipeline_mode<synchronous>, transform_indices = @transform_2, window_bounds = array<i64: 128, 128>}, {pipeline_mode = #tpu.pipeline_mode<synchronous>, transform_indices = @transform_3, window_bounds = array<i64: 1, 128>}, {pipeline_mode = #tpu.pipeline_mode<synchronous>, transform_indices = @transform_4, window_bounds = array<i64: 128, 128>}, {pipeline_mode = #tpu.pipeline_mode<synchronous>, transform_indices = @transform_5, window_bounds = array<i64: 1, 128>}, {pipeline_mode = #tpu.pipeline_mode<synchronous>, transform_indices = @transform_6, window_bounds = array<i64: 128, 128>}, {pipeline_mode = #tpu.pipeline_mode<synchronous>, transform_indices = @transform_7, window_bounds = array<i64: 1, 128>}, {pipeline_mode = #tpu.pipeline_mode<synchronous>, transform_indices = @transform_8, window_bounds = array<i64: 128, 128>}, {pipeline_mode = #tpu.pipeline_mode<synchronous>, transform_indices = @transform_9, window_bounds = array<i64: 1, 128>}, {transform_indices = @transform_10, window_bounds = array<i64: 32, 128>}]} {
    %c0_i32 = arith.constant 0 : i32
    %0 = arith.cmpi eq, %arg1, %c0_i32 : i32
    %1 = arith.extui %0 : i1 to i32
    %c0_i32_0 = arith.constant 0 : i32
    %2 = arith.cmpi ne, %1, %c0_i32_0 : i32
    scf.if %2 {
      %cst_27 = arith.constant 0.000000e+00 : f32
      %43 = vector.broadcast %cst_27 : f32 to vector<32x128xf32>
      %c0_28 = arith.constant 0 : index
      %c0_29 = arith.constant 0 : index
      %44 = vector.load %arg13[%c0_28, %c0_29] : memref<32x128xf32, #tpu.memory_space<vmem>>, vector<32x128xf32>
      tpu.vector_store %arg13[%c0_28, %c0_29], %43 {strides = array<i32>} : memref<32x128xf32, #tpu.memory_space<vmem>>, vector<32x128xf32>,
    } else {
    }
    %c0 = arith.constant 0 : index
    %c0_1 = arith.constant 0 : index
    %3 = vector.load %arg2[%c0, %c0_1] : memref<32x128xbf16, #tpu.memory_space<vmem>>, vector<32x128xbf16>
    %c0_2 = arith.constant 0 : index
    %c0_3 = arith.constant 0 : index
    %4 = vector.load %arg3[%c0_2, %c0_3] : memref<32x128xbf16, #tpu.memory_space<vmem>>, vector<32x128xbf16>
    %c0_4 = arith.constant 0 : index
    %c0_5 = arith.constant 0 : index
    %5 = vector.load %arg4[%c0_4, %c0_5] : memref<128x128xbf16, #tpu.memory_space<vmem>>, vector<128x128xbf16>
    %cst = arith.constant dense<0.000000e+00> : vector<32x128xf32>
    %6 = tpu.matmul %3, %5, %cst {dimension_numbers = #tpu.dot_dimension_numbers<[1], [0], [0], [1], [0, 0, 1, 1], [], []>} : vector<32x128xbf16>, vector<128x128xbf16>, vector<32x128xf32> -> vector<32x128xf32>
    %c0_6 = arith.constant 0 : index
    %c0_7 = arith.constant 0 : index
    %7 = vector.load %arg5[%c0_6, %c0_7] : memref<1x128xf32, #tpu.memory_space<vmem>>, vector<1x128xf32>
    %8 = vector.broadcast %7 : vector<1x128xf32> to vector<32x128xf32>
    %9 = arith.addf %6, %8 : vector<32x128xf32>
    %10 = arith.mulf %9, %9 : vector<32x128xf32>
    %11 = arith.mulf %9, %10 : vector<32x128xf32>
    %cst_8 = arith.constant 4.471500e-02 : f32
    %12 = vector.broadcast %cst_8 : f32 to vector<32x128xf32>
    %13 = arith.mulf %12, %11 : vector<32x128xf32>
    %14 = arith.addf %9, %13 : vector<32x128xf32>
    %cst_9 = arith.constant 0.797884583 : f32
    %15 = vector.broadcast %cst_9 : f32 to vector<32x128xf32>
    %16 = arith.mulf %15, %14 : vector<32x128xf32>
    %17 = math.tanh %16 : vector<32x128xf32>
    %cst_10 = arith.constant 1.000000e+00 : f32
    %18 = vector.broadcast %cst_10 : f32 to vector<32x128xf32>
    %19 = arith.addf %18, %17 : vector<32x128xf32>
    %cst_11 = arith.constant 5.000000e-01 : f32
    %20 = vector.broadcast %cst_11 : f32 to vector<32x128xf32>
    %21 = arith.mulf %20, %19 : vector<32x128xf32>
    %22 = arith.mulf %9, %21 : vector<32x128xf32>
    %c0_12 = arith.constant 0 : index
    %c0_13 = arith.constant 0 : index
    %23 = vector.load %arg6[%c0_12, %c0_13] : memref<128x128xbf16, #tpu.memory_space<vmem>>, vector<128x128xbf16>
    %cst_14 = arith.constant dense<0.000000e+00> : vector<32x128xf32>
    %24 = tpu.matmul %4, %23, %cst_14 {dimension_numbers = #tpu.dot_dimension_numbers<[1], [0], [0], [1], [0, 0, 1, 1], [], []>} : vector<32x128xbf16>, vector<128x128xbf16>, vector<32x128xf32> -> vector<32x128xf32>
    %c0_15 = arith.constant 0 : index
    %c0_16 = arith.constant 0 : index
    %25 = vector.load %arg7[%c0_15, %c0_16] : memref<1x128xf32, #tpu.memory_space<vmem>>, vector<1x128xf32>
    %26 = vector.broadcast %25 : vector<1x128xf32> to vector<32x128xf32>
    %27 = arith.addf %24, %26 : vector<32x128xf32>
    %28 = arith.negf %27 : vector<32x128xf32>
    %29 = math.exp %28 : vector<32x128xf32>
    %cst_17 = arith.constant 1.000000e+00 : f32
    %30 = vector.broadcast %cst_17 : f32 to vector<32x128xf32>
    %31 = arith.addf %30, %29 : vector<32x128xf32>
    %32 = arith.divf %30, %31 : vector<32x128xf32>
    %33 = arith.mulf %22, %32 : vector<32x128xf32>
    %c0_18 = arith.constant 0 : index
    %c0_19 = arith.constant 0 : index
    %34 = vector.load %arg13[%c0_18, %c0_19] : memref<32x128xf32, #tpu.memory_space<vmem>>, vector<32x128xf32>
    %35 = arith.truncf %33 : vector<32x128xf32> to vector<32x128xbf16>
    %c0_20 = arith.constant 0 : index
    %c0_21 = arith.constant 0 : index
    %36 = vector.load %arg8[%c0_20, %c0_21] : memref<128x128xbf16, #tpu.memory_space<vmem>>, vector<128x128xbf16>
    %cst_22 = arith.constant dense<0.000000e+00> : vector<32x128xf32>
    %37 = tpu.matmul %35, %36, %cst_22 {dimension_numbers = #tpu.dot_dimension_numbers<[1], [0], [0], [1], [0, 0, 1, 1], [], []>} : vector<32x128xbf16>, vector<128x128xbf16>, vector<32x128xf32> -> vector<32x128xf32>
    %38 = arith.addf %34, %37 : vector<32x128xf32>
    %c0_23 = arith.constant 0 : index
    %c0_24 = arith.constant 0 : index
    %39 = vector.load %arg13[%c0_23, %c0_24] : memref<32x128xf32, #tpu.memory_space<vmem>>, vector<32x128xf32>
    tpu.vector_store %arg13[%c0_23, %c0_24], %38 {strides = array<i32>} : memref<32x128xf32, #tpu.memory_space<vmem>>, vector<32x128xf32>,
    %c0_i32_25 = arith.constant 0 : i32
    %40 = arith.cmpi eq, %arg1, %c0_i32_25 : i32
    %41 = arith.extui %40 : i1 to i32
    %c0_i32_26 = arith.constant 0 : i32
    %42 = arith.cmpi ne, %41, %c0_i32_26 : i32
    scf.if %42 {
      %c0_27 = arith.constant 0 : index
      %c0_28 = arith.constant 0 : index
      %43 = vector.load %arg13[%c0_27, %c0_28] : memref<32x128xf32, #tpu.memory_space<vmem>>, vector<32x128xf32>
      %c0_29 = arith.constant 0 : index
      %c0_30 = arith.constant 0 : index
      %44 = vector.load %arg9[%c0_29, %c0_30] : memref<1x128xf32, #tpu.memory_space<vmem>>, vector<1x128xf32>
      %45 = vector.broadcast %44 : vector<1x128xf32> to vector<32x128xf32>
      %46 = arith.addf %43, %45 : vector<32x128xf32>
      %47 = arith.mulf %46, %46 : vector<32x128xf32>
      %48 = arith.mulf %46, %47 : vector<32x128xf32>
      %cst_31 = arith.constant 4.471500e-02 : f32
      %49 = vector.broadcast %cst_31 : f32 to vector<32x128xf32>
      %50 = arith.mulf %49, %48 : vector<32x128xf32>
      %51 = arith.addf %46, %50 : vector<32x128xf32>
      %cst_32 = arith.constant 0.797884583 : f32
      %52 = vector.broadcast %cst_32 : f32 to vector<32x128xf32>
      %53 = arith.mulf %52, %51 : vector<32x128xf32>
      %54 = math.tanh %53 : vector<32x128xf32>
      %cst_33 = arith.constant 1.000000e+00 : f32
      %55 = vector.broadcast %cst_33 : f32 to vector<32x128xf32>
      %56 = arith.addf %55, %54 : vector<32x128xf32>
      %cst_34 = arith.constant 5.000000e-01 : f32
      %57 = vector.broadcast %cst_34 : f32 to vector<32x128xf32>
      %58 = arith.mulf %57, %56 : vector<32x128xf32>
      %59 = arith.mulf %46, %58 : vector<32x128xf32>
      %c0_35 = arith.constant 0 : index
      %c0_36 = arith.constant 0 : index
      %60 = vector.load %arg10[%c0_35, %c0_36] : memref<128x128xbf16, #tpu.memory_space<vmem>>, vector<128x128xbf16>
      %cst_37 = arith.constant dense<0.000000e+00> : vector<32x128xf32>
      %61 = tpu.matmul %4, %60, %cst_37 {dimension_numbers = #tpu.dot_dimension_numbers<[1], [0], [0], [1], [0, 0, 1, 1], [], []>} : vector<32x128xbf16>, vector<128x128xbf16>, vector<32x128xf32> -> vector<32x128xf32>
      %c0_38 = arith.constant 0 : index
      %c0_39 = arith.constant 0 : index
      %62 = vector.load %arg11[%c0_38, %c0_39] : memref<1x128xf32, #tpu.memory_space<vmem>>, vector<1x128xf32>
      %63 = vector.broadcast %62 : vector<1x128xf32> to vector<32x128xf32>
      %64 = arith.addf %61, %63 : vector<32x128xf32>
      %65 = arith.negf %64 : vector<32x128xf32>
      %66 = math.exp %65 : vector<32x128xf32>
      %cst_40 = arith.constant 1.000000e+00 : f32
      %67 = vector.broadcast %cst_40 : f32 to vector<32x128xf32>
      %68 = arith.addf %67, %66 : vector<32x128xf32>
      %69 = arith.divf %67, %68 : vector<32x128xf32>
      %70 = arith.mulf %59, %69 : vector<32x128xf32>
      %71 = arith.extf %3 : vector<32x128xbf16> to vector<32x128xf32>
      %72 = arith.addf %70, %71 : vector<32x128xf32>
      %c0_41 = arith.constant 0 : index
      %c0_42 = arith.constant 0 : index
      %73 = vector.load %arg12[%c0_41, %c0_42] : memref<32x128xf32, #tpu.memory_space<vmem>>, vector<32x128xf32>
      tpu.vector_store %arg12[%c0_41, %c0_42], %72 {strides = array<i32>} : memref<32x128xf32, #tpu.memory_space<vmem>>, vector<32x128xf32>,
    } else {
    }
    return
  }
  func.func @transform_0(%arg0: i32, %arg1: i32) -> (i32, i32) {
    %c0_i32 = arith.constant 0 : i32
    %c0_i32_0 = arith.constant 0 : i32
    return %arg0, %c0_i32 : i32, i32
  }
  func.func @transform_1(%arg0: i32, %arg1: i32) -> (i32, i32) {
    %c0_i32 = arith.constant 0 : i32
    %c0_i32_0 = arith.constant 0 : i32
    return %arg0, %c0_i32 : i32, i32
  }
  func.func @transform_2(%arg0: i32, %arg1: i32) -> (i32, i32) {
    %c0_i32 = arith.constant 0 : i32
    %c0_i32_0 = arith.constant 0 : i32
    return %c0_i32, %arg1 : i32, i32
  }
  func.func @transform_3(%arg0: i32, %arg1: i32) -> (i32, i32) {
    %c0_i32 = arith.constant 0 : i32
    %c0_i32_0 = arith.constant 0 : i32
    return %c0_i32, %arg1 : i32, i32
  }
  func.func @transform_4(%arg0: i32, %arg1: i32) -> (i32, i32) {
    %c0_i32 = arith.constant 0 : i32
    %c0_i32_0 = arith.constant 0 : i32
    return %c0_i32, %arg1 : i32, i32
  }
  func.func @transform_5(%arg0: i32, %arg1: i32) -> (i32, i32) {
    %c0_i32 = arith.constant 0 : i32
    %c0_i32_0 = arith.constant 0 : i32
    return %c0_i32, %arg1 : i32, i32
  }
  func.func @transform_6(%arg0: i32, %arg1: i32) -> (i32, i32) {
    %c0_i32 = arith.constant 0 : i32
    %c0_i32_0 = arith.constant 0 : i32
    return %arg1, %c0_i32 : i32, i32
  }
  func.func @transform_7(%arg0: i32, %arg1: i32) -> (i32, i32) {
    %c0_i32 = arith.constant 0 : i32
    %c0_i32_0 = arith.constant 0 : i32
    %c0_i32_1 = arith.constant 0 : i32
    return %c0_i32, %c0_i32_0 : i32, i32
  }
  func.func @transform_8(%arg0: i32, %arg1: i32) -> (i32, i32) {
    %c0_i32 = arith.constant 0 : i32
    %c0_i32_0 = arith.constant 0 : i32
    %c0_i32_1 = arith.constant 0 : i32
    return %c0_i32, %c0_i32_0 : i32, i32
  }
  func.func @transform_9(%arg0: i32, %arg1: i32) -> (i32, i32) {
    %c0_i32 = arith.constant 0 : i32
    %c0_i32_0 = arith.constant 0 : i32
    %c0_i32_1 = arith.constant 0 : i32
    return %c0_i32, %c0_i32_0 : i32, i32
  }
  func.func @transform_10(%arg0: i32, %arg1: i32) -> (i32, i32) {
    %c0_i32 = arith.constant 0 : i32
    %c0_i32_0 = arith.constant 0 : i32
    return %arg0, %c0_i32 : i32, i32
  }
}

</mosaic_0001>

<bundles_post_ra>
// kernel: tpu_custom_call.1
= control target key start
LH: loop header
LB: loop body
LE: loop exit
PB: predicated region body
PF: predicated region fallthrough
CT: control target
= control target key end

     0   :  { %s2568_s0 = inlined_call_operand.hbm [shape: bf16[64,128], index: 0, kind: input, shape index: {}]   ;;  %s2569_s1 = inlined_call_operand.hbm [shape: bf16[64,128], index: 1, kind: input, shape index: {}]   ;;  %s2570_s2 = inlined_call_operand.hbm [shape: bf16[128,128], index: 2, kind: input, shape index: {}]   ;;  %s2571_s3 = inlined_call_operand.vmem [shape: f32[1,128], index: 3, kind: input, shape index: {}]   ;;  %s2572_s4 = inlined_call_operand.hbm [shape: bf16[128,128], index: 4, kind: input, shape index: {}]   ;;  %s2573_s5 = inlined_call_operand.vmem [shape: f32[1,128], index: 5, kind: input, shape index: {}]   ;;  %s2574_s6 = inlined_call_operand.hbm [shape: bf16[128,128], index: 6, kind: input, shape index: {}]   ;;  %s2575_s7 = inlined_call_operand.vmem [shape: f32[1,128], index: 7, kind: input, shape index: {}]   ;;  %s2576_s8 = inlined_call_operand.hbm [shape: bf16[128,128], index: 8, kind: input, shape index: {}]   ;;  %s2577_s9 = inlined_call_operand.vmem [shape: f32[1,128], index: 9, kind: input, shape index: {}]   ;;  %s2578_s10 = inlined_call_operand.hbm [shape: f32[64,128], index: 10, kind: output, shape index: {}]  }
   0x1   :  { %2589 = sst [smem:[#allocation24_spill]] %s2568_s0 }
   0x2   :  { %2590 = sst [smem:[#allocation25_spill]] %s2570_s2 }
   0x3   :  { %2591 = sst [smem:[#allocation26_spill]] %s2572_s4 }
   0x4   :  { %2592 = sst [smem:[#allocation27_spill]] %s2574_s6 }
   0x5   :  { %2593 = sst [smem:[#allocation28_spill]] %s2575_s7 }
   0x6   :  { %2594 = sst [smem:[#allocation29_spill]] %s2576_s8 }
   0x7   :  { %2595 = sst [smem:[#allocation30_spill]] %s2577_s9 }
   0x8   :  { %2596 = sst [smem:[#allocation31_spill]] %s2578_s10 }
   0x9   :  { %15 = vsyncpa [#allocation4], 0 }
   0xa   :  { %17 = vsyncpa [#allocation4 + $0x1], 0 }
   0xb   :  { %18 = vsyncpa [#allocation7], 0 }
   0xc   :  { %20 = vsyncpa [#allocation7 + $0x1], 0 }
   0xd   :  { %21 = vsyncpa [#allocation10], 0 }
   0xe   :  { %22 = vsyncpa [#allocation13], 0 }
   0xf   :  { %23 = vsyncpa [#allocation5], 0 }
  0x10   :  { %25 = vsyncpa [#allocation5 + $0x1], 0  ;;  %s2150_s13 = smov 0   ;;  %s2152_s14 = smov 0  }
  0x11   :  { %s2154_s15 = smov 0   ;;  %s2156_s16 = smov 0  }
  0x12   :  { %s2158_s17 = smov 0   ;;  %s2160_s18 = smov 0  }
  0x13 LB: > { %2597 = sst [smem:[#allocation21_spill]] %s2062_s13  ;;  %s2181_s19 = sadd.s32 4294967295, %s2082_s18   ;;  %s2082_s18 = sphi %s2160_s18, %s31_s18   ;;  %s2078_s17 = sphi %s2158_s17, %s2636_s17   ;;  %s2074_s16 = sphi %s2156_s16, %s2635_s16   ;;  %s2070_s15 = sphi %s2154_s15, %s2634_s15   ;;  %s2066_s14 = sphi %s2152_s14, %s2633_s14   ;;  %s2062_s13 = sphi %s2150_s13, %s2632_s13  }
  0x14   : > { %2598 = sst [smem:[#allocation22_spill]] %s2074_s16  ;;  %s1415_s20 = sadd.s32 4294967294, %s2082_s18  }
  0x15   : > { %p63_p0 = scmp.ne.s32.totalorder %s2066_s14, %s2062_s13  ;;  %p2581_p1 = scmp.eq.s32.totalorder %s2181_s19, 0 }
  0x16   : > { %p312_p3 = scmp.eq.s32.totalorder %s1415_s20, 1  ;;  %p1416_p5 = scmp.ge.s32.totalorder %s2082_s18, 1 }
  0x17   : > { %p2190_p4 = por %p2581_p1, %p63_p0  ;;  %p319_p7 = scmp.lt.s32.totalorder %s2082_s18, 3 }
  0x18   : > { %p2195_p6 = por %p312_p3, %p63_p0  ;;  %s2084_s24 = smov [#allocation8]  }
  0x19   : > { %s2599_s21 = scalar_select %p2190_p4, 1, 0 }
  0x1a   : > { %s2600_s22 = scalar_select %p2195_p6, 1, 0 }
  0x1b   : > { %p2200_p8 = pnand %p1416_p5, %p319_p7  ;;  %s333_s25 = sshll.u32 %s2084_s24, 4  ;;  %s2204_s25 = int_to_ptr.vmem [resolvable:$true] %s333_s25 }
  0x1c   : > { %2601 = sst [smem:[#allocation23_spill]] %s2600_s22  ;;  %s2085_s27 = smov [#allocation9]  }
  0x1d   : > { %s2602_s23 = scalar_select %p2200_p8, 1, 0 }
  0x1e   : > { %p1636_p9 = pneg %p2200_p8  ;;  %s354_s28 = sshll.u32 %s2085_s27, 4  ;;  %s2215_s28 = int_to_ptr.vmem [resolvable:$true] %s354_s28 }
  0x1f   : > { %s2086_s29 = smov [#allocation11]   ;;  %s2604_s2 = sld [smem:[#allocation25_spill]] }
  0x20   : > { %p2211_p11 = pnand %p1636_p9, %p2581_p1  ;;  %s2217_s30 = sshll.u32 %s2086_s29, 4  ;;  %s377_s30 = int_to_ptr.vmem [resolvable:$true] %s2217_s30 }
  0x22   : > { %p2227_p13 = pneg %p2211_p11 }
  0x25   : > { %s1812_s20 = scalar_lea.hbm %s2604_s2, 1024 }
  0x26   : > { %p1813_p12 = scmp.ne.s32.totalorder %s2604_s2, %s1812_s20  ;;  %p1819_p5 = scmp.lt.u32.totalorder %s1812_s20, %s2604_s2 }
  0x28   : > { %p1815_p0 = pnand %p2227_p13, %p1813_p12 }
  0x2a   : > { %p1816_p3 = pneg %p1815_p0 }
  0x2c   : > { %p1821_p7 = pnand %p1819_p5, %p1816_p3 }
  0x2e   : > { %1824 = shalt.err (!%p1821_p7)
}
  0x2f   : > { %s1825_s22 = scalar_lea.vmem %s2204_s25, 1024  ;;  %p1833_p2 = scmp.lt.s32.totalorder %s2204_s25, %s2204_s25 }
  0x30   : > { %p1826_p9 = scmp.ne.s32.totalorder %s2204_s25, %s1825_s22  ;;  %p1834_p6 = scmp.lt.s32.totalorder %s1825_s22, %s1825_s22 }
  0x32   : > { %p1828_p10 = pnand %p1826_p9, %p2227_p13  ;;  %p1835_p12 = por %p1834_p6, %p1833_p2 }
  0x34   : > { %p1829_p1 = pneg %p1828_p10 }
  0x36   : > { %p1836_p0 = pnand %p1835_p12, %p1829_p1 }
  0x38   : > { %1839 = shalt.err (!%p1836_p0)
}
  0x39   : > { %s2585_s11 = smov 64   ;;  %s2587_s12 = smov 4  }
  0x3a   : > { %1639 = dma.hbm_to_vmem [thread:$0]  (!%p2211_p11), %s2604_s2, 1024, %s2204_s25, [#allocation7], %s2585_s11, %s2585_s11, %s2587_s12  }
  0x3b   : > { %s2606_s4 = sld [smem:[#allocation26_spill]] }
  0x41   : > { %s1840_s22 = scalar_lea.hbm %s2606_s4, 1024 }
  0x42   : > { %p1841_p1 = scmp.ne.s32.totalorder %s2606_s4, %s1840_s22  ;;  %p1847_p10 = scmp.lt.u32.totalorder %s1840_s22, %s2606_s4 }
  0x44   : > { %p1843_p2 = pnand %p1841_p1, %p2227_p13 }
  0x46   : > { %p1844_p6 = pneg %p1843_p2 }
  0x48   : > { %p1849_p3 = pnand %p1847_p10, %p1844_p6 }
  0x4a   : > { %1852 = shalt.err (!%p1849_p3)
}
  0x4b   : > { %s1853_s25 = scalar_lea.vmem %s2215_s28, 1024  ;;  %p1861_p12 = scmp.lt.s32.totalorder %s2215_s28, %s2215_s28 }
  0x4c   : > { %p1854_p5 = scmp.ne.s32.totalorder %s2215_s28, %s1853_s25  ;;  %p1862_p0 = scmp.lt.s32.totalorder %s1853_s25, %s1853_s25 }
  0x4e   : > { %p1856_p7 = pnand %p1854_p5, %p2227_p13  ;;  %p1863_p1 = por %p1862_p0, %p1861_p12 }
  0x50   : > { %p1857_p9 = pneg %p1856_p7 }
  0x52   : > { %p1864_p2 = pnand %p1863_p1, %p1857_p9 }
  0x54   : > { %1867 = shalt.err (!%p1864_p2)
}
  0x55   : > { %1642 = dma.hbm_to_vmem [thread:$0]  (!%p2211_p11), %s2606_s4, 1024, %s2215_s28, [#allocation10], %s2585_s11, %s2585_s11, %s2587_s12  }
  0x56   : > { %s2607_s6 = sld [smem:[#allocation27_spill]] }
  0x5c   : > { %s1868_s20 = scalar_lea.hbm %s2607_s6, 1024 }
  0x5d   : > { %p1869_p6 = scmp.ne.s32.totalorder %s2607_s6, %s1868_s20  ;;  %p1875_p5 = scmp.lt.u32.totalorder %s1868_s20, %s2607_s6 }
  0x5f   : > { %p1871_p10 = pnand %p1869_p6, %p2227_p13 }
  0x61   : > { %p1872_p3 = pneg %p1871_p10 }
  0x63   : > { %p1877_p7 = pnand %p1875_p5, %p1872_p3 }
  0x65   : > { %1880 = shalt.err (!%p1877_p7)
}
  0x66   : > { %s1881_s25 = scalar_lea.vmem %s377_s30, 1024  ;;  %p1889_p1 = scmp.lt.s32.totalorder %s377_s30, %s377_s30 }
  0x67   : > { %p1882_p9 = scmp.ne.s32.totalorder %s377_s30, %s1881_s25  ;;  %p1890_p2 = scmp.lt.s32.totalorder %s1881_s25, %s1881_s25 }
  0x69   : > { %p1884_p12 = pnand %p1882_p9, %p2227_p13  ;;  %p1891_p4 = por %p1890_p2, %p1889_p1 }
  0x6b   : > { %p1885_p0 = pneg %p1884_p12 }
  0x6d   : > { %p1892_p8 = pnand %p1891_p4, %p1885_p0 }
  0x6f   : > { %1895 = shalt.err (!%p1892_p8)
}
  0x70   : > { %1645 = dma.hbm_to_vmem [thread:$0]  (!%p2211_p11), %s2607_s6, 1024, %s377_s30, [#allocation10], %s2585_s11, %s2585_s11, %s2587_s12  }
  0x71   : > { %s2089_s9 = smov [#allocation12]   ;;  %s2608_s8 = sld [smem:[#allocation29_spill]] }
  0x72   : > { %s392_s10 = sshll.u32 %s2089_s9, 4  ;;  %s393_s10 = int_to_ptr.vmem [resolvable:$true] %s392_s10 }
  0x77   : > { %s1896_s24 = scalar_lea.hbm %s2608_s8, 1024 }
  0x78   : > { %p1897_p4 = scmp.ne.s32.totalorder %s2608_s8, %s1896_s24  ;;  %p1903_p10 = scmp.lt.u32.totalorder %s1896_s24, %s2608_s8 }
  0x7a   : > { %p1899_p8 = pnand %p1897_p4, %p2227_p13 }
  0x7c   : > { %p1900_p6 = pneg %p1899_p8 }
  0x7e   : > { %p1905_p3 = pnand %p1903_p10, %p1900_p6 }
  0x80   : > { %1908 = shalt.err (!%p1905_p3)
}
  0x81   : > { %s1909_s30 = scalar_lea.vmem %s393_s10, 1024  ;;  %p1917_p12 = scmp.lt.s32.totalorder %s393_s10, %s393_s10 }
  0x82   : > { %p1910_p5 = scmp.ne.s32.totalorder %s393_s10, %s1909_s30  ;;  %p1918_p0 = scmp.lt.s32.totalorder %s1909_s30, %s1909_s30 }
  0x84   : > { %p1912_p7 = pnand %p1910_p5, %p2227_p13  ;;  %p1919_p1 = por %p1918_p0, %p1917_p12 }
  0x86   : > { %p1913_p9 = pneg %p1912_p7 }
  0x88   : > { %p1920_p2 = pnand %p1919_p1, %p1913_p9 }
  0x8a   : > { %1923 = shalt.err (!%p1920_p2)
}
  0x8b   : > { %1648 = dma.hbm_to_vmem [thread:$0]  (!%p2211_p11), %s2608_s8, 1024, %s393_s10, [#allocation13], %s2585_s11, %s2585_s11, %s2587_s12  }
  0x8c   : > { %s43_s13 = sadd.s32 1, %s2078_s17  ;;  %s50_s26 = sadd.s32 1, %s2070_s15 }
  0x8d   : > { %p45_p13 = scmp.ge.s32.totalorder %s43_s13, 2  ;;  %p57_p4 = scmp.ne.s32.totalorder %s2070_s15, %s2066_s14 }
  0x8e   : > { %p58_p8 = scmp.eq.s32.totalorder %s2082_s18, 0  ;;  %p1664_p6 = scmp.lt.s32.totalorder %s2082_s18, 2 }
  0x8f   : > { %s2638_s13 = smov (%p45_p13, %s43_s13), 0  ;;  %p2609_p3 = scmp.eq.s32.totalorder %s2181_s19, 1 }
  0x90   : > { %p59_p10 = por %p58_p8, %p57_p4  ;;  %s47_s16 = ssub.s32 %s2078_s17, %s2638_s13 }
  0x91   : > { %p2330_p5 = por %p2609_p3, %p57_p4  ;;  %s409_s20 = sand.u32 1, %s2070_s15  }
  0x92   : > { %p48_p7 = scmp.eq.s32.totalorder %s47_s16, 0  ;;  %s2337_s10 = sshll.u32 %s409_s20, 4 }
  0x93   : > { %s1491_s24 = sshll.u32 %s2078_s17, 8  ;;  %s2611_s0 = sld [smem:[#allocation24_spill]] }
  0x94   : > { %s2341_s27 = scalar_select %p48_p7, %s2070_s15, %s50_s26  }
  0x95   : > { %s413_s30 = scalar_lea.vmem [#allocation3], %s2337_s10  ;;  %p2351_p11 = pnand %p1664_p6, %p59_p10 }
  0x96   : > { %s420_s28 = sshll.u32 %s413_s30, 4  ;;  %s2360_s29 = scalar_lea.hbm %s2569_s1, %s1491_s24  ;;  %s2355_s28 = int_to_ptr.vmem [resolvable:$true] %s420_s28 }
  0x97   : > { %s2362_s22 = scalar_lea.sflag [#allocation4], %s409_s20  ;;  %p1926_p12 = pneg %p2351_p11 }
  0x99   : > { %s2346_s25 = scalar_lea.hbm %s2611_s0, %s1491_s24  ;;  %s1929_s2 = scalar_lea.hbm %s2611_s0, 512 }
  0x9a   : > { %s1924_s11 = scalar_lea.hbm %s2346_s25, 256  ;;  %p1930_p2 = scmp.lt.u32.totalorder %s2346_s25, %s2611_s0 }
  0x9b   : > { %p1925_p9 = scmp.ne.s32.totalorder %s2346_s25, %s1924_s11  ;;  %p1931_p13 = scmp.lt.u32.totalorder %s1929_s2, %s1924_s11 }
  0x9c   : > { %p1933_p8 = scmp.lt.u32.totalorder %s1924_s11, %s2346_s25 }
  0x9d   : > { %p1927_p0 = pnand %p1926_p12, %p1925_p9  ;;  %p1932_p4 = por %p1931_p13, %p1930_p2 }
  0x9f   : > { %p1928_p1 = pneg %p1927_p0  ;;  %p1934_p6 = por %p1933_p8, %p1932_p4 }
  0xa1   : > { %p1935_p10 = pnand %p1934_p6, %p1928_p1 }
  0xa3   : > { %1938 = shalt.err (!%p1935_p10)
}
  0xa4   : > { %s1939_s20 = scalar_lea.vmem %s2355_s28, 256  ;;  %s2090_s12 = smov [#allocation3]  }
  0xa5   : > { %p1940_p3 = scmp.ne.s32.totalorder %s2355_s28, %s1939_s20  ;;  %s1944_s24 = sshll.u32 %s2090_s12, 4  ;;  %s1945_s24 = int_to_ptr.vmem [resolvable:$false] %s1944_s24 }
  0xa6   : > { %s1946_s4 = scalar_lea.vmem %s1945_s24, 512  ;;  %p1947_p0 = scmp.lt.s32.totalorder %s2355_s28, %s1945_s24 }
  0xa7   : > { %p1942_p7 = pnand %p1940_p3, %p1926_p12  ;;  %p1948_p2 = scmp.lt.s32.totalorder %s1946_s4, %s1939_s20 }
  0xa9   : > { %p1943_p9 = pneg %p1942_p7  ;;  %p1949_p13 = por %p1948_p2, %p1947_p0 }
  0xab   : > { %p1950_p4 = pnand %p1949_p13, %p1943_p9 }
  0xad   : > { %1953 = shalt.err (!%p1950_p4)
}
  0xae   : > { %s2613_s2 = smov 4   ;;  %s2614_s6 = smov 64  }
  0xaf   : > { %1652 = dma.hbm_to_vmem [thread:$0]  (!%p2351_p11), %s2346_s25, 256, %s2355_s28, %s2362_s22, %s2614_s6, %s2614_s6, %s2613_s2  }
  0xb0   : > { %s434_s11 = scalar_lea.vmem [#allocation6], %s2337_s10  ;;  %s430_s16 = sand.u32 1, %s2082_s18  }
  0xb1   : > { %s441_s26 = sshll.u32 %s434_s11, 4  ;;  %s2397_s30 = scalar_lea.sflag [#allocation7], %s430_s16  ;;  %s2395_s26 = int_to_ptr.vmem [resolvable:$true] %s441_s26 }
  0xb2   : > { %s1954_s20 = scalar_lea.hbm %s2360_s29, 256  ;;  %s1959_s4 = scalar_lea.hbm %s2569_s1, 512 }
  0xb3   : > { %p1955_p1 = scmp.ne.s32.totalorder %s2360_s29, %s1954_s20  ;;  %p1960_p10 = scmp.lt.u32.totalorder %s2360_s29, %s2569_s1 }
  0xb4   : > { %p1961_p3 = scmp.lt.u32.totalorder %s1959_s4, %s1954_s20  ;;  %p1963_p9 = scmp.lt.u32.totalorder %s1954_s20, %s2360_s29 }
  0xb5   : > { %p1957_p8 = pnand %p1955_p1, %p1926_p12 }
  0xb6   : > { %p1962_p7 = por %p1961_p3, %p1960_p10 }
  0xb7   : > { %p1958_p6 = pneg %p1957_p8 }
  0xb8   : > { %p1964_p0 = por %p1963_p9, %p1962_p7 }
  0xba   : > { %p1965_p2 = pnand %p1964_p0, %p1958_p6 }
  0xbc   : > { %1968 = shalt.err (!%p1965_p2)
}
  0xbd   : > { %s1969_s10 = scalar_lea.vmem %s2395_s26, 256  ;;  %s2091_s25 = smov [#allocation6]  }
  0xbe   : > { %p1970_p13 = scmp.ne.s32.totalorder %s2395_s26, %s1969_s10  ;;  %s1974_s28 = sshll.u32 %s2091_s25, 4  ;;  %s1975_s28 = int_to_ptr.vmem [resolvable:$false] %s1974_s28 }
  0xbf   : > { %s1976_s0 = scalar_lea.vmem %s1975_s28, 512  ;;  %p1977_p8 = scmp.lt.s32.totalorder %s2395_s26, %s1975_s28 }
  0xc0   : > { %p1972_p4 = pnand %p1970_p13, %p1926_p12  ;;  %p1978_p10 = scmp.lt.s32.totalorder %s1976_s0, %s1969_s10 }
  0xc2   : > { %p1973_p1 = pneg %p1972_p4  ;;  %p1979_p3 = por %p1978_p10, %p1977_p8 }
  0xc4   : > { %p1980_p7 = pnand %p1979_p3, %p1973_p1 }
  0xc6   : > { %1983 = shalt.err (!%p1980_p7)
}
  0xc7   : > { %1655 = dma.hbm_to_vmem [thread:$0]  (!%p2351_p11), %s2360_s29, 256, %s2395_s26, %s2397_s30, %s2614_s6, %s2614_s6, %s2613_s2  }
  0xc8   : > { %p2615_p12 = scmp.ne.s32.totalorder %s2602_s23, 0 }
  0xc9   : > { %s2429_s8 = sand.u32 (!%p2615_p12), 1, %s2066_s14   ;;  %p2616_p6 = scmp.ne.s32.totalorder (!%p2615_p12), %s2599_s21, 0 }
  0xca   : > { %453 = sbr.rel (%p2615_p12) target bundleno = 768 (0x300), region = 60  ;;  %s1431_s22 = sshll.u32 (!%p2615_p12), %s2429_s8, 4 }
  0xcb   : > { %s456_s11 = scalar_lea.sflag (!%p2615_p12), [#allocation4], %s2429_s8  ;;  %s2433_s16 = scalar_lea.vmem (!%p2615_p12), [#allocation3], %s1431_s22 }
  0xd1   : > { %2037 = dma.done.wait (%p2616_p6), %s456_s11, 256  }
  0xd2   : > { %2039 = vsyncadd (%p2616_p6), %s456_s11, 4294967040  ;;  %s464_s7 = sand.u32 1, %s2181_s19   ;;  %s2440_s29 = scalar_lea.vmem [#allocation6], %s1431_s22 }
  0xd3   : > { %s465_s23 = scalar_lea.sflag [#allocation7], %s464_s7 }
  0xd4   : > { %2041 = dma.done.wait (%p2616_p6), %s465_s23, 256  }
  0xd5   : > { %2043 = vsyncadd (%p2616_p6), %s465_s23, 4294967040  ;;  %p2617_p11 = scmp.eq.s32.totalorder %s2181_s19, 0 }
  0xd7   : > { %2045 = dma.done.wait (%p2617_p11), [#allocation7], 1024   ;;  %p2618_p9 = pmov %p2617_p11 }
  0xd9   : > { %2047 = vsyncadd (%p2618_p9), [#allocation7], 4294966272  ;;  %p2619_p0 = pmov %p2618_p9 }
  0xdb   : > { %2049 = dma.done.wait (%p2619_p0), [#allocation10], 2048   ;;  %p2620_p2 = pmov %p2619_p0 }
  0xdc   : > { %p2621_p13 = pmov %p2619_p0 }
  0xdd   : > { %2051 = vsyncadd (%p2620_p2), [#allocation10], 4294965248 }
  0xde   : > { %2053 = dma.done.wait (%p2621_p13), [#allocation13], 1024   ;;  %p2622_p4 = pmov %p2619_p0 }
  0xdf   : > { %v1726_v0 = vld [vmem:[#allocation8] sm:$0xff]   ;;  %v1728_v2 = vld [vmem:[#allocation8 + $0x8] sm:$0xff]   ;;  %v1730_v4 = vld [vmem:[#allocation8 + $0x10] sm:$0xff]   ;;  %s2623_s20 = sld [smem:[#allocation30_spill]]  ;;  %s2624_s4 = sld [smem:[#allocation28_spill]] }
  0xe0   : > { %2055 = vsyncadd (%p2622_p4), [#allocation13], 4294966272  ;;  %v1727_v1 = vld [vmem:[#allocation9] sm:$0xff]   ;;  %1534 = vmatprep.subr.bf16.mxu0 %v1726_v0  ;;  %v1729_v3 = vld [vmem:[#allocation9 + $0x8] sm:$0xff]   ;;  %s1437_s10 = sshll.u32 %s2429_s8, 5  ;;  %s2625_s25 = sld [smem:[#allocation22_spill]] }
  0xe1   : > { %1554 = vmatprep.subr.bf16.mxu1 %v1727_v1  ;;  %1535 = vmatpush3.bf16.msra.mxu0 %v1726_v0  ;;  %v1731_v5 = vld [vmem:[#allocation9 + $0x10] sm:$0xff]   ;;  %v1732_v6 = vld [vmem:[#allocation8 + $0x18] sm:$0xff]   ;;  %v1734_v8 = vld [vmem:[#allocation8 + $0x20] sm:$0xff]   ;;  %s531_s0 = scalar_lea.vmem [#allocation14], %s1437_s10  ;;  %s2626_s7 = sld [smem:[#allocation31_spill]] }
  0xe2   : > { %1555 = vmatpush3.bf16.msra.mxu1 %v1727_v1  ;;  %1536 = vmatprep.subr.bf16.mxu0 %v1728_v2  ;;  %v1733_v7 = vld [vmem:[#allocation9 + $0x18] sm:$0xff]   ;;  %v1735_v9 = vld [vmem:[#allocation9 + $0x20] sm:$0xff]   ;;  %v1736_v10 = vld [vmem:[#allocation8 + $0x28] sm:$0xff]   ;;  %s1242_s22 = sshll.u32 %s531_s0, 4  ;;  %s2092_s21 = smov [#allocation14]   ;;  %s2519_s22 = int_to_ptr.vmem [resolvable:$true] %s1242_s22 }
  0xe3   : > { %1556 = vmatprep.subr.bf16.mxu1 %v1729_v3  ;;  %v2459_v11 = vld [vmem:[%s2433_s16] sm:$0xff]   ;;  %v1737_v12 = vld [vmem:[#allocation9 + $0x28] sm:$0xff]   ;;  %v1740_v16 = vld [vmem:[#allocation8 + $0x38] sm:$0xff]   ;;  %s1984_s19 = scalar_lea.vmem %s2519_s22, 512  ;;  %s1988_s2 = sshll.u32 %s2092_s21, 4  ;;  %s1989_s2 = int_to_ptr.vmem [resolvable:$false] %s1988_s2 }
  0xe4   : > { %v1743_v13 = vld [vmem:[%s2440_s29] sm:$0xff]   ;;  %1550 = vmatprep.mubr.bf16.mxu0 %v2459_v11  ;;  %v1741_v17 = vld [vmem:[#allocation9 + $0x38] sm:$0xff]   ;;  %v1748_v22 = vld [vmem:[#allocation12 + $0x8] sm:$0xff]   ;;  %p1985_p1 = scmp.ne.s32.totalorder %s2519_s22, %s1984_s19  ;;  %s1990_s6 = scalar_lea.vmem %s1989_s2, 1024 }
  0xe5   : > { %1537 = vmatpush3.bf16.msra.mxu0 %v1728_v2  ;;  %v1738_v14 = vld [vmem:[#allocation8 + $0x30] sm:$0xff]   ;;  %1570 = vmatprep.mubr.bf16.mxu1 %v1743_v13  ;;  %v2464_v18 = vld [vmem:[%s2433_s16 + $0x8] sm:$0xff]   ;;  %v1746_v20 = vld [vmem:[#allocation12] sm:$0xff]   ;;  %p1991_p3 = scmp.lt.s32.totalorder %s2519_s22, %s1989_s2  ;;  %p1992_p7 = scmp.lt.s32.totalorder %s1990_s6, %s1984_s19 }
  0xe6   : > { %1557 = vmatpush3.bf16.msra.mxu1 %v1729_v3  ;;  %1538 = vmatprep.subr.bf16.mxu0 %v1730_v4  ;;  %v1739_v15 = vld [vmem:[#allocation9 + $0x30] sm:$0xff]   ;;  %v1745_v19 = vld [vmem:[%s2440_s29 + $0x8] sm:$0xff]   ;;  %v1747_v21 = vld [vmem:[#allocation11] sm:$0xff]   ;;  %s1493_s28 = sshll.u32 %s2625_s25, 9  ;;  %s1229_s29 = scalar_lea.sflag [#allocation5], %s2429_s8 }
  0xe7   : > { %1558 = vmatprep.subr.bf16.mxu1 %v1731_v5  ;;  %v1749_v23 = vld [vmem:[#allocation11 + $0x8] sm:$0xff]   ;;  %v1750_v24 = vld [vmem:[#allocation12 + $0x10] sm:$0xff]   ;;  %v1752_v26 = vld [vmem:[#allocation12 + $0x18] sm:$0xff]   ;;  %s2517_s23 = scalar_lea.hbm %s2626_s7, %s1493_s28  ;;  %p1986_p8 = pnand %p1985_p1, %p2330_p5 }
  0xe8   : > { %v1751_v25 = vld [vmem:[#allocation11 + $0x10] sm:$0xff]   ;;  %v1753_v27 = vld [vmem:[#allocation11 + $0x18] sm:$0xff]   ;;  %v1754_v28 = vld [vmem:[#allocation12 + $0x20] sm:$0xff]   ;;  %p1993_p12 = por %p1992_p7, %p1991_p3 }
  0xe9   : > { %1539 = vmatpush3.bf16.msra.mxu0 %v1730_v4  ;;  %v1755_v29 = vld [vmem:[#allocation11 + $0x20] sm:$0xff]   ;;  %v1756_v30 = vld [vmem:[#allocation12 + $0x28] sm:$0xff]   ;;  %v1758_v32 = vld [vmem:[#allocation12 + $0x30] sm:$0xff]   ;;  %p1987_p10 = pneg %p1986_p8 }
  0xea   : > { %1559 = vmatpush3.bf16.msra.mxu1 %v1731_v5  ;;  %1540 = vmatprep.subr.bf16.mxu0 %v1732_v6  ;;  %v1757_v31 = vld [vmem:[#allocation11 + $0x28] sm:$0xff]   ;;  %v1759_v33 = vld [vmem:[#allocation11 + $0x30] sm:$0xff]   ;;  %v1760_v34 = vld [vmem:[#allocation12 + $0x38] sm:$0xff]  }
  0xeb   : > { %1560 = vmatprep.subr.bf16.mxu1 %v1733_v7  ;;  %v1761_v35 = vld [vmem:[#allocation11 + $0x38] sm:$0xff]   ;;  %v1438_v36 = vld [vmem:[%s2571_s3] ss:$0 sm:$0xff]  ;;  %p1994_p6 = pnand %p1993_p12, %p1987_p10 }
  0xec   : > { %v1449_v37 = vld [vmem:[%s2573_s5] ss:$0 sm:$0xff] }
  0xed   : > { %1541 = vmatpush3.bf16.msra.mxu0 %v1732_v6 }
  0xee   : > { %1561 = vmatpush3.bf16.msra.mxu1 %v1733_v7  ;;  %1542 = vmatprep.subr.bf16.mxu0 %v1734_v8 }
  0xef   : > { %1562 = vmatprep.subr.bf16.mxu1 %v1735_v9 }
  0xf1   : > { %1543 = vmatpush3.bf16.msra.mxu0 %v1734_v8 }
  0xf2   : > { %1563 = vmatpush3.bf16.msra.mxu1 %v1735_v9  ;;  %1544 = vmatprep.subr.bf16.mxu0 %v1736_v10 }
  0xf3   : > { %1564 = vmatprep.subr.bf16.mxu1 %v1737_v12 }
  0xf5   : > { %1545 = vmatpush3.bf16.msra.mxu0 %v1736_v10 }
  0xf6   : > { %1565 = vmatpush3.bf16.msra.mxu1 %v1737_v12  ;;  %1546 = vmatprep.subr.bf16.mxu0 %v1738_v14 }
  0xf7   : > { %1566 = vmatprep.subr.bf16.mxu1 %v1739_v15 }
  0xf9   : > { %1547 = vmatpush3.bf16.msra.mxu0 %v1738_v14 }
  0xfa   : > { %1567 = vmatpush3.bf16.msra.mxu1 %v1739_v15  ;;  %1548 = vmatprep.subr.bf16.mxu0 %v1740_v16 }
  0xfb   : > { %1568 = vmatprep.subr.bf16.mxu1 %v1741_v17 }
  0xfd   : > { %1549 = vmatpush3.bf16.msra.mxu0 %v1740_v16 }
  0xfe   : > { %1569 = vmatpush3.bf16.msra.mxu1 %v1741_v17  ;;  %1574 = vmatprep.subr.bf16.mxu0 %v1747_v21 }
  0xff   : > { %1594 = vmatprep.subr.bf16.mxu1 %v1746_v20 }
 0x100   : > { %1551 = vmatmul.mubr.bf16.vlgmr.msra.gmra.mrb[0].mxu0 %v2464_v18 }
 0x101   : > { %1571 = vmatmul.mubr.bf16.vlgmr.msra.gmra.mrb[0].mxu1 %v1745_v19  ;;  %1575 = vmatpush3.bf16.msra.mxu0 %v1747_v21 }
 0x102   : > { %1610 = vmatprep.mubr.bf16.mxu1 %v1743_v13  ;;  %1595 = vmatpush3.bf16.msra.mxu1 %v1746_v20 }
 0x103   : > { %1596 = vmatprep.subr.bf16.mxu1 %v1748_v22  ;;  %1576 = vmatprep.subr.bf16.mxu0 %v1749_v23 }
 0x105   : > { %1577 = vmatpush3.bf16.msra.mxu0 %v1749_v23 }
 0x106   : > { %1597 = vmatpush3.bf16.msra.mxu1 %v1748_v22  ;;  %1578 = vmatprep.subr.bf16.mxu0 %v1751_v25 }
 0x107   : > { %1598 = vmatprep.subr.bf16.mxu1 %v1750_v24 }
 0x109   : > { %1579 = vmatpush3.bf16.msra.mxu0 %v1751_v25 }
 0x10a   : > { %1599 = vmatpush3.bf16.msra.mxu1 %v1750_v24  ;;  %1580 = vmatprep.subr.bf16.mxu0 %v1753_v27 }
 0x10b   : > { %1600 = vmatprep.subr.bf16.mxu1 %v1752_v26 }
 0x10d   : > { %1581 = vmatpush3.bf16.msra.mxu0 %v1753_v27 }
 0x10e   : > { %1601 = vmatpush3.bf16.msra.mxu1 %v1752_v26  ;;  %1582 = vmatprep.subr.bf16.mxu0 %v1755_v29 }
 0x10f   : > { %1602 = vmatprep.subr.bf16.mxu1 %v1754_v28 }
 0x111   : > { %1583 = vmatpush3.bf16.msra.mxu0 %v1755_v29 }
 0x112   : > { %1603 = vmatpush3.bf16.msra.mxu1 %v1754_v28  ;;  %1584 = vmatprep.subr.bf16.mxu0 %v1757_v31 }
 0x113   : > { %1604 = vmatprep.subr.bf16.mxu1 %v1756_v30 }
 0x115   : > { %1585 = vmatpush3.bf16.msra.mxu0 %v1757_v31 }
 0x116   : > { %1605 = vmatpush3.bf16.msra.mxu1 %v1756_v30  ;;  %1586 = vmatprep.subr.bf16.mxu0 %v1759_v33 }
 0x117   : > { %1606 = vmatprep.subr.bf16.mxu1 %v1758_v32 }
 0x119   : > { %1587 = vmatpush3.bf16.msra.mxu0 %v1759_v33 }
 0x11a   : > { %1607 = vmatpush3.bf16.msra.mxu1 %v1758_v32  ;;  %1588 = vmatprep.subr.bf16.mxu0 %v1761_v35 }
 0x11b   : > { %1608 = vmatprep.subr.bf16.mxu1 %v1760_v34 }
 0x11d   : > { %1589 = vmatpush3.bf16.msra.mxu0 %v1761_v35 }
 0x11e   : > { %1609 = vmatpush3.bf16.msra.mxu1 %v1760_v34 }
 0x121   : > { %1611 = vmatmul.mubr.bf16.vlgmr.msra.gmra.mrb[4].mxu1 %v1745_v19 }
 0x1d3   : > { %v1552_v38 = vpop.f32.mrb[0].mxu0 }
 0x1d4   : > { %v2474_v39 = vadd.f32 %v1552_v38, %v1438_v36  ;;  %v1572_v40 = vpop.f32.mrb[0].mxu1  ;;  %v676_v41 = vpop.f32.mrb[1].mxu0 }
 0x1d5   : > { %v853_v42 = vadd.f32 %v1572_v40, %v1449_v37  ;;  %v2476_v43 = vadd.f32 %v1438_v36, %v676_v41  ;;  %v844_v44 = vpop.f32.mrb[1].mxu1  ;;  %v1553_v45 = vpop.f32.mrb[2].mxu0 }
 0x1d6   : > { %v693_v46 = vmul.f32 %v2474_v39, %v2474_v39  ;;  %v845_v47 = vadd.f32 %v1449_v37, %v844_v44  ;;  %v2480_v48 = vadd.f32 %v1553_v45, %v1438_v36  ;;  %v1573_v49 = vpop.f32.mrb[2].mxu1  ;;  %v679_v50 = vpop.f32.mrb[3].mxu0 }
 0x1d7   : > { %v1462_v51 = vmul.f32 -1.442695, %v853_v42  ;;  %v691_v52 = vmul.f32 %v2476_v43, %v2476_v43  ;;  %v856_v53 = vadd.f32 %v1573_v49, %v1449_v37  ;;  %v2484_v54 = vadd.f32 %v1438_v36, %v679_v50  ;;  %v847_v55 = vpop.f32.mrb[3].mxu1 }
 0x1d8   : > { %v697_v56 = vmul.f32 %v693_v46, %v2474_v39  ;;  %v1460_v57 = vmul.f32 -1.442695, %v845_v47  ;;  %v694_v58 = vmul.f32 %v2480_v48, %v2480_v48  ;;  %v848_v59 = vadd.f32 %v1449_v37, %v847_v55 }
 0x1d9   : > { %1764 = vpow2.f32 %v1462_v51  ;;  %v695_v60 = vmul.f32 %v691_v52, %v2476_v43  ;;  %v1463_v61 = vmul.f32 -1.442695, %v856_v53  ;;  %v692_v62 = vmul.f32 %v2484_v54, %v2484_v54 }
 0x1da   : > { %v701_v63 = vmul.f32 0.044715, %v697_v56  ;;  %1766 = vpow2.f32 %v1460_v57  ;;  %v698_v0 = vmul.f32 %v694_v58, %v2480_v48  ;;  %v1461_v1 = vmul.f32 -1.442695, %v848_v59 }
 0x1db   : > { %v699_v2 = vmul.f32 0.044715, %v695_v60  ;;  %1768 = vpow2.f32 %v1463_v61  ;;  %v696_v3 = vmul.f32 %v692_v62, %v2484_v54  ;;  %v1472_v61 = vld [vmem:[%s2624_s4] ss:$0 sm:$0xff] }
 0x1dc   : > { %v705_v4 = vadd.f32 %v701_v63, %v2474_v39  ;;  %v702_v5 = vmul.f32 0.044715, %v698_v0  ;;  %1770 = vpow2.f32 %v1461_v1 }
 0x1dd   : > { %v703_v6 = vadd.f32 %v699_v2, %v2476_v43  ;;  %v700_v7 = vmul.f32 0.044715, %v696_v3 }
 0x1de   : > { %v709_v8 = vmul.f32 0.7978846, %v705_v4  ;;  %v706_v9 = vadd.f32 %v702_v5, %v2480_v48 }
 0x1df   : > { %v707_v10 = vmul.f32 0.7978846, %v703_v6  ;;  %v704_v12 = vadd.f32 %v700_v7, %v2484_v54 }
 0x1e0   : > { %1772 = vtanh.f32 %v709_v8  ;;  %v710_v13 = vmul.f32 0.7978846, %v706_v9 }
 0x1e1   : > { %1774 = vtanh.f32 %v707_v10  ;;  %v708_v14 = vmul.f32 0.7978846, %v704_v12 }
 0x1e2   : > { %1776 = vtanh.f32 %v710_v13 }
 0x1e3   : > { %v1765_v15 = vpop.eup %1764  ;;  %1778 = vtanh.f32 %v708_v14 }
 0x1e4   : > { %v1767_v16 = vpop.eup %1766  ;;  %v873_v17 = vadd.f32 1.0, %v1765_v15 }
 0x1e5   : > { %v1769_v19 = vpop.eup %1768  ;;  %v871_v20 = vadd.f32 1.0, %v1767_v16 }
 0x1e6   : > { %v1771_v21 = vpop.eup %1770  ;;  %1780 = vrcp.f32 %v873_v17  ;;  %v874_v22 = vadd.f32 1.0, %v1769_v19 }
 0x1e7   : > { %1782 = vrcp.f32 %v871_v20  ;;  %v872_v23 = vadd.f32 1.0, %v1771_v21 }
 0x1e8   : > { %1784 = vrcp.f32 %v874_v22 }
 0x1e9   : > { %1786 = vrcp.f32 %v872_v23 }
 0x1ea   : > { %v1773_v24 = vpop.eup %1772 }
 0x1eb   : > { %v1775_v25 = vpop.eup %1774  ;;  %v717_v26 = vadd.f32 1.0, %v1773_v24 }
 0x1ec   : > { %v1777_v27 = vpop.eup %1776  ;;  %v715_v28 = vadd.f32 1.0, %v1775_v25 }
 0x1ed   : > { %v1779_v29 = vpop.eup %1778  ;;  %v721_v30 = vmul.f32 0.5, %v717_v26  ;;  %v718_v31 = vadd.f32 1.0, %v1777_v27 }
 0x1ee   : > { %v716_v32 = vadd.f32 1.0, %v1779_v29  ;;  %v719_v33 = vmul.f32 0.5, %v715_v28 }
 0x1ef   : > { %v725_v34 = vmul.f32 %v721_v30, %v2474_v39  ;;  %v722_v35 = vmul.f32 0.5, %v718_v31 }
 0x1f0   : > { %v1781_v36 = vpop.eup %1780  ;;  %v720_v37 = vmul.f32 0.5, %v716_v32  ;;  %v723_v38 = vmul.f32 %v719_v33, %v2476_v43  ;;  %v1473_v43 = vld [vmem:[%s2623_s20] ss:$0 sm:$0xff] }
 0x1f1   : > { %v1783_v40 = vpop.eup %1782  ;;  %v726_v41 = vmul.f32 %v722_v35, %v2480_v48  ;;  %v885_v42 = vmul.f32 %v1781_v36, %v725_v34 }
 0x1f2   : > { %v1785_v44 = vpop.eup %1784  ;;  %v724_v45 = vmul.f32 %v720_v37, %v2484_v54  ;;  %v883_v46 = vmul.f32 %v1783_v40, %v723_v38 }
 0x1f3   : > { %v1787_v47 = vpop.eup %1786  ;;  %v886_v49 = vmul.f32 %v1785_v44, %v726_v41 }
 0x1f4   : > { %v884_v50 = vmul.f32 %v1787_v47, %v724_v45  ;;  %v1612_v39 = vpop.f32.mrb[4].mxu1 }
 0x1f5   : > { %v892_v51 = vpack.c.bf16 %v886_v49, %v885_v42  ;;  %v1173_v53 = vpop.f32.mrb[5].mxu1  ;;  %v1182_v48 = vadd.f32 %v1612_v39, %v1473_v43  ;;  %v1218_v39 = vunpack.c.l.bf16 %v2464_v18 }
 0x1f6   : > { %v891_v52 = vpack.c.bf16 %v884_v50, %v883_v46  ;;  %v1613_v55 = vpop.f32.mrb[6].mxu1  ;;  %v1174_v57 = vadd.f32 %v1473_v43, %v1173_v53 }
 0x1f7   : > { %v1176_v56 = vpop.f32.mrb[7].mxu1  ;;  %v1484_v58 = vmul.f32 -1.442695, %v1182_v48  ;;  %v1185_v54 = vadd.f32 %v1613_v55, %v1473_v43 }
 0x1f8   : > { %1590 = vmatprep.mubr.bf16.mxu0 %v891_v52  ;;  %v1482_v59 = vmul.f32 -1.442695, %v1174_v57  ;;  %v1177_v60 = vadd.f32 %v1473_v43, %v1176_v56  ;;  %v1216_v56 = vunpack.c.l.bf16 %v2459_v11  ;;  %v1219_v57 = vunpack.c.h.bf16 %v2464_v18 }
 0x1f9   : > { %1591 = vmatmul.mubr.bf16.vlgmr.msra.gmra.mrb[4].mxu0 %v892_v51  ;;  %1788 = vpow2.f32 %v1484_v58  ;;  %v1485_v63 = vmul.f32 -1.442695, %v1185_v54 }
 0x1fa   : > { %1790 = vpow2.f32 %v1482_v59  ;;  %v1483_v2 = vmul.f32 -1.442695, %v1177_v60  ;;  %v1217_v60 = vunpack.c.h.bf16 %v2459_v11 }
 0x1fb   : > { %1792 = vpow2.f32 %v1485_v63 }
 0x1fc   : > { %1794 = vpow2.f32 %v1483_v2 }
 0x203   : > { %v1789_v22 = vpop.eup %1788 }
 0x204   : > { %v1791_v25 = vpop.eup %1790  ;;  %v1202_v30 = vadd.f32 1.0, %v1789_v22 }
 0x205   : > { %v1793_v32 = vpop.eup %1792  ;;  %v1200_v33 = vadd.f32 1.0, %v1791_v25 }
 0x206   : > { %v1795_v35 = vpop.eup %1794  ;;  %v1203_v36 = vadd.f32 1.0, %v1793_v32 }
 0x207   : > { %v1201_v37 = vadd.f32 1.0, %v1795_v35 }
 0x2cc   : > { %v1592_v62 = vpop.f32.mrb[4].mxu0 }
 0x2cd   : > { %v1030_v0 = vadd.f32 %v1592_v62, %v1472_v61  ;;  %v991_v1 = vpop.f32.mrb[5].mxu0 }
 0x2ce   : > { %v1028_v3 = vadd.f32 %v1472_v61, %v991_v1  ;;  %v1593_v4 = vpop.f32.mrb[6].mxu0 }
 0x2cf   : > { %v1034_v5 = vmul.f32 %v1030_v0, %v1030_v0  ;;  %v1031_v6 = vadd.f32 %v1593_v4, %v1472_v61  ;;  %v994_v7 = vpop.f32.mrb[7].mxu0 }
 0x2d0   : > { %v1032_v8 = vmul.f32 %v1028_v3, %v1028_v3  ;;  %v1029_v9 = vadd.f32 %v1472_v61, %v994_v7 }
 0x2d1   : > { %v1038_v10 = vmul.f32 %v1034_v5, %v1030_v0  ;;  %v1035_v12 = vmul.f32 %v1031_v6, %v1031_v6 }
 0x2d2   : > { %v1036_v13 = vmul.f32 %v1032_v8, %v1028_v3  ;;  %v1033_v14 = vmul.f32 %v1029_v9, %v1029_v9 }
 0x2d3   : > { %v1042_v15 = vmul.f32 0.044715, %v1038_v10  ;;  %v1039_v16 = vmul.f32 %v1035_v12, %v1031_v6 }
 0x2d4   : > { %v1040_v17 = vmul.f32 0.044715, %v1036_v13  ;;  %v1037_v19 = vmul.f32 %v1033_v14, %v1029_v9 }
 0x2d5   : > { %v1046_v20 = vadd.f32 %v1042_v15, %v1030_v0  ;;  %v1043_v21 = vmul.f32 0.044715, %v1039_v16 }
 0x2d6   : > { %v1044_v23 = vadd.f32 %v1040_v17, %v1028_v3  ;;  %v1041_v24 = vmul.f32 0.044715, %v1037_v19 }
 0x2d7   : > { %v1050_v26 = vmul.f32 0.7978846, %v1046_v20  ;;  %v1047_v27 = vadd.f32 %v1043_v21, %v1031_v6 }
 0x2d8   : > { %v1048_v28 = vmul.f32 0.7978846, %v1044_v23  ;;  %v1045_v29 = vadd.f32 %v1041_v24, %v1029_v9 }
 0x2d9   : > { %1796 = vtanh.f32 %v1050_v26  ;;  %v1051_v31 = vmul.f32 0.7978846, %v1047_v27 }
 0x2da   : > { %1798 = vtanh.f32 %v1048_v28  ;;  %v1049_v34 = vmul.f32 0.7978846, %v1045_v29 }
 0x2db   : > { %1800 = vtanh.f32 %v1051_v31 }
 0x2dc   : > { %1802 = vtanh.f32 %v1049_v34 }
 0x2dd   : > { %1804 = vrcp.f32 %v1202_v30 }
 0x2de   : > { %1806 = vrcp.f32 %v1200_v33 }
 0x2df   : > { %1808 = vrcp.f32 %v1203_v36 }
 0x2e0   : > { %1810 = vrcp.f32 %v1201_v37 }
 0x2e3   : > { %v1797_v38 = vpop.eup %1796 }
 0x2e4   : > { %v1799_v40 = vpop.eup %1798  ;;  %v1058_v41 = vadd.f32 1.0, %v1797_v38 }
 0x2e5   : > { %v1801_v42 = vpop.eup %1800  ;;  %v1056_v44 = vadd.f32 1.0, %v1799_v40 }
 0x2e6   : > { %v1803_v45 = vpop.eup %1802  ;;  %v1062_v46 = vmul.f32 0.5, %v1058_v41  ;;  %v1059_v47 = vadd.f32 1.0, %v1801_v42 }
 0x2e7   : > { %v1805_v49 = vpop.eup %1804  ;;  %v1060_v50 = vmul.f32 0.5, %v1056_v44  ;;  %v1057_v51 = vadd.f32 1.0, %v1803_v45 }
 0x2e8   : > { %v1807_v52 = vpop.eup %1806  ;;  %v1066_v53 = vmul.f32 %v1062_v46, %v1030_v0  ;;  %v1063_v55 = vmul.f32 0.5, %v1059_v47 }
 0x2e9   : > { %v1064_v43 = vmul.f32 %v1060_v50, %v1028_v3  ;;  %v1061_v48 = vmul.f32 0.5, %v1057_v51  ;;  %v1809_v59 = vpop.eup %1808 }
 0x2ea   : > { %v1214_v58 = vmul.f32 %v1805_v49, %v1066_v53  ;;  %v1067_v54 = vmul.f32 %v1063_v55, %v1031_v6  ;;  %v1811_v63 = vpop.eup %1810 }
 0x2eb   : > { %v1212_v61 = vmul.f32 %v1807_v52, %v1064_v43  ;;  %v1065_v62 = vmul.f32 %v1061_v48, %v1029_v9 }
 0x2ec   : > { %v1222_v0 = vadd.f32 %v1218_v39, %v1214_v58  ;;  %v1215_v1 = vmul.f32 %v1809_v59, %v1067_v54 }
 0x2ed   : > { %v1220_v2 = vadd.f32 %v1216_v56, %v1212_v61  ;;  %v1213_v3 = vmul.f32 %v1811_v63, %v1065_v62 }
 0x2ee   : > { %1226 = vst [vmem:[%s531_s0 + $0x10] sm:$0xff] %v1222_v0  ;;  %v1223_v4 = vadd.f32 %v1219_v57, %v1215_v1 }
 0x2ef   : > { %1224 = vst [vmem:[%s531_s0] sm:$0xff] %v1220_v2  ;;  %v1221_v11 = vadd.f32 %v1217_v60, %v1213_v3 }
 0x2f0   : > { %1227 = vst [vmem:[%s531_s0 + $0x18] sm:$0xff] %v1223_v4 }
 0x2f1   : > { %1225 = vst [vmem:[%s531_s0 + $0x8] sm:$0xff] %v1221_v11 }
 0x2f2   : > { %1997 = shalt.err (!%p1994_p6)
}
 0x2f3   : > { %s1998_s26 = scalar_lea.hbm %s2517_s23, 512  ;;  %s2002_s12 = scalar_lea.hbm %s2626_s7, 1024 }
 0x2f4   : > { %p1999_p11 = scmp.ne.s32.totalorder %s2517_s23, %s1998_s26  ;;  %p2003_p2 = scmp.lt.u32.totalorder %s2517_s23, %s2626_s7 }
 0x2f5   : > { %p2004_p13 = scmp.lt.u32.totalorder %s2002_s12, %s1998_s26  ;;  %p2006_p1 = scmp.lt.u32.totalorder %s1998_s26, %s2517_s23 }
 0x2f6   : > { %p2000_p9 = pnand %p1999_p11, %p2330_p5 }
 0x2f7   : > { %p2005_p4 = por %p2004_p13, %p2003_p2 }
 0x2f8   : > { %p2001_p0 = pneg %p2000_p9 }
 0x2f9   : > { %p2007_p8 = por %p2006_p1, %p2005_p4 }
 0x2fb   : > { %p2008_p10 = pnand %p2007_p8, %p2001_p0 }
 0x2fd   : > { %2011 = shalt.err (!%p2008_p10)
}
 0x2fe   : > { %s2093_s10 = smov 128   ;;  %s2094_s25 = smov 8  }
 0x2ff   : > { %1634 = dma.vmem_to_hbm [thread:$0]  (%p2330_p5), %s2519_s22, 512, %s2517_s23, %s1229_s29, %s2093_s10, %s2093_s10, %s2094_s25  }
 0x300 PF: > { %s2627_s28 = sld [smem:[#allocation21_spill]]  ;;  %s2628_s0 = sld [smem:[#allocation23_spill]] }
 0x301   : > { %p2630_p7 = scmp.ge.s32.totalorder %s2082_s18, 2 }
 0x306   : > { %s1257_s11 = sand.u32 1, %s2627_s28   ;;  %p2629_p3 = scmp.ne.s32.totalorder %s2628_s0, 0 }
 0x307   : > { %s1258_s16 = scalar_lea.sflag [#allocation5], %s1257_s11 }
 0x308   : > { %p1657_p12 = pnand %p2630_p7, %p2629_p3 }
 0x30a   : > { %2057 = dma.done.wait (!%p1657_p12), %s1258_s16, 512  }
 0x30b   : > { %2059 = vsyncadd (!%p1657_p12), %s1258_s16, 4294966784  ;;  %s31_s18 = sadd.s32 1, %s2082_s18   ;;  %s2631_s9 = smov %s2638_s13 }
 0x30c   : > { %p28_p6 = scmp.ge.s32.totalorder %s31_s18, 4   ;;  %s2632_s13 = smov %s2066_s14 }
 0x30d   : > { %s2633_s14 = smov %s2070_s15  ;;  %s2634_s15 = smov %s2341_s27 }
 0x30e   : > { %s2635_s16 = smov %s2078_s17  ;;  %s2636_s17 = smov %s2631_s9 }
 0x30f   :  { %30 = sbr.rel (!%p28_p6) target bundleno = 19 (0x13), region = 151 }
 0x316   :  { %1263 = vsyncpa [#allocation4], 1 }
 0x317   :  { %1265 = vsyncpa [#allocation4 + $0x1], 1 }
 0x318   :  { %1266 = vsyncpa [#allocation7], 1 }
 0x319   :  { %1268 = vsyncpa [#allocation7 + $0x1], 1 }
 0x31a   :  { %1269 = vsyncpa [#allocation10], 1 }
 0x31b   :  { %1270 = vsyncpa [#allocation13], 1 }
 0x31c   :  { %1271 = vsyncpa [#allocation5], 1 }
 0x31d   :  { %1273 = vsyncpa [#allocation5 + $0x1], 1 }

</bundles_post_ra>
